<compile_context>
chip_gen: v7x
topology: tpu7x:2x2x1
jax: 0.10.0
libtpu: 0.0.40
codegen_flags: <defaults>
</compile_context>

<pallas_src>
import functools

import jax
import jax.numpy as jnp
from jax.experimental import pallas as pl
from jax.experimental.pallas import tpu as pltpu


def _attn_kernel(x_ref, wqkv_ref, bqkv_ref, wo_ref, bo_ref, o_ref, *,
                 n_heads, head_dim, bt, seq):
    hd = n_heads * head_dim
    cdt = x_ref.dtype                         # matmul operand dtype (f32 / bf16)

    # ---- fused Q|K|V projection over all folded batch rows ------------------
    # x_ref is already flat (bt*seq, 2*input_dim); one MXU chain, one bias add.
    qkv = jnp.dot(x_ref[...], wqkv_ref[...], preferred_element_type=jnp.float32)
    qkv = qkv + bqkv_ref[...].astype(jnp.float32)             # (bt*seq, 3*hd)

    # 1/sqrt(head_dim) is already folded into Wq / bq (wrapper).
    # Leading-dim split (seq is sublane-aligned for the demo shapes) -> no
    # lane relayout.
    q = qkv[:, 0 * hd:1 * hd].astype(cdt).reshape(bt, seq, hd)
    k = qkv[:, 1 * hd:2 * hd].astype(cdt).reshape(bt, seq, hd)
    v = qkv[:, 2 * hd:3 * hd].astype(cdt).reshape(bt, seq, hd)

    # ---- attention: short static loop over heads, batched over bt -----------
    ctx_heads = []
    for h in range(n_heads):
        cols = slice(h * head_dim, (h + 1) * head_dim)
        qh, kh, vh = q[:, :, cols], k[:, :, cols], v[:, :, cols]
        s = jnp.einsum('bqd,bkd->bqk', qh, kh,
                       preferred_element_type=jnp.float32)    # (bt, seq, seq)
        s = s - jnp.max(s, axis=-1, keepdims=True)
        p = jnp.exp(s)
        inv = pl.reciprocal(jnp.sum(p, axis=-1, keepdims=True), approx=False)
        p = (p * inv).astype(cdt)
        ctx_heads.append(jnp.einsum('bqk,bkd->bqd', p, vh,
                                    preferred_element_type=jnp.float32))

    # Fuse heads along lanes (H*d lanes), merge leading dims, one K=H*d matmul.
    ctx = jnp.concatenate(ctx_heads, axis=-1).reshape(bt * seq, hd)

    # ---- fused output projection over all folded batch rows -----------------
    out = jnp.dot(ctx.astype(cdt), wo_ref[...],
                  preferred_element_type=jnp.float32)
    out = out + bo_ref[...].astype(jnp.float32)
    o_ref[...] = out.astype(o_ref.dtype)


def _vmem_bytes_estimate(bt, seq, two_d_in, hd, od, itemsize):
    """Rough per-grid-step VMEM footprint (double-buffered blocks + temps)."""
    rows = bt * seq
    x_blk = 2 * rows * two_d_in * itemsize
    out_blk = 2 * rows * od * itemsize
    weights = 2 * (two_d_in * 3 * hd + 3 * hd + hd * od + od) * itemsize
    qkv = rows * 3 * hd * 4 * 2                 # f32 qkv + cast copies
    scores = bt * seq * seq * 4 * 2             # scores + softmax temporaries
    ctx = rows * hd * 4
    return x_blk + out_blk + weights + qkv + scores + ctx


def _choose_block_batch(B, seq, two_d_in, hd, od, itemsize, *,
                        target_rows=256, vmem_budget=24 << 20):
    """Pick batch-fold Bt (batches processed per grid step).

    Prefer the smallest fold that fills the MXU M-dim (Bt*seq >= target_rows,
    256 = v6e/v7x MXU width); otherwise fold the whole batch into one fat step
    (v5e/v6e serialize the grid on a single TensorCore, so extra steps only
    add ~0.35us each).  Shrink if the per-step working set exceeds the VMEM
    byte budget (keeps v7x's 64 MiB happy at real model dims).
    """
    divisors = [d for d in range(1, B + 1) if B % d == 0]
    filling = [d for d in divisors if d * seq >= target_rows]
    bt = min(filling) if filling else max(divisors)
    for d in sorted(divisors, reverse=True):
        if d <= bt and _vmem_bytes_estimate(d, seq, two_d_in, hd, od,
                                            itemsize) <= vmem_budget:
            return d
    return 1


def partclipseg_concat_self_attention(combined_data, params, *, n_heads,
                                      output_dim, block_batch=None,
                                      compute_dtype=None):
    """combined_data: (B, N, 2*input_dim).  Returns (B, N, output_dim)."""
    B, N, two_d_in = combined_data.shape
    hd = n_heads * output_dim
    wq, bq, wk, bk, wv, bv, wo, bo = params

    # Fuse Q/K/V weights & biases into one matmul operand; fold the
    # 1/sqrt(head_dim) attention scale into the query columns (free: the
    # concatenate copies anyway).
    scale = 1.0 / (output_dim ** 0.5)
    wqkv = jnp.concatenate([wq * scale, wk, wv], axis=1)       # (2*D_in, 3*hd)
    bqkv = jnp.concatenate([bq * scale, bk, bv], axis=1)       # (1, 3*hd)

    if compute_dtype is not None:              # e.g. bf16 on v6e/v7x; keep f32 on v5e
        combined_data = combined_data.astype(compute_dtype)
        wqkv = wqkv.astype(compute_dtype)
        bqkv = bqkv.astype(compute_dtype)
        wo = wo.astype(compute_dtype)
        bo = bo.astype(compute_dtype)

    itemsize = jnp.dtype(combined_data.dtype).itemsize
    bt = (_choose_block_batch(B, N, two_d_in, hd, output_dim, itemsize)
          if block_batch is None else block_batch)
    assert B % bt == 0, (B, bt)
    # Block second-minor dim must be a multiple of 8 unless it spans the array.
    if bt < B and (bt * N) % 8 != 0:
        bt = B

    # 3D -> 2D flattening done in the wrapper (free on a contiguous HBM array);
    # the kernel only ever sees lane-native 2-D tiles.
    x2d = combined_data.reshape(B * N, two_d_in)
    rows = bt * N

    kernel = functools.partial(_attn_kernel, n_heads=n_heads,
                               head_dim=output_dim, bt=bt, seq=N)

    # Weights / biases: constant block index across the whole grid.
    # TODO(synk): at real model dims, add pipeline_mode=pl.Buffered(1) on these
    # constant-index specs to reclaim a weight-sized buffer on 64 MiB v7x.
    full = lambda shape: pl.BlockSpec(shape, lambda b: (0, 0))

    vmem_est = _vmem_bytes_estimate(bt, N, two_d_in, hd, output_dim, itemsize)
    vmem_limit = int(min(vmem_est * 2, 64 << 20)) if vmem_est > (32 << 20) else None

    out2d = pl.pallas_call(
        kernel,
        out_shape=jax.ShapeDtypeStruct((B * N, output_dim), combined_data.dtype),
        grid_spec=pltpu.PrefetchScalarGridSpec(
            num_scalar_prefetch=0,
            grid=(B // bt,),
            in_specs=[
                pl.BlockSpec((rows, two_d_in), lambda b: (b, 0)),   # x (flat)
                full((two_d_in, 3 * hd)),                           # Wq|Wk|Wv
                full((1, 3 * hd)),                                  # bq|bk|bv
                full((hd, output_dim)),                             # Wo
                full((1, output_dim)),                              # bo
            ],
            out_specs=pl.BlockSpec((rows, output_dim), lambda b: (b, 0)),
        ),
        compiler_params=pltpu.CompilerParams(
            dimension_semantics=("parallel",),
            vmem_limit_bytes=vmem_limit),
    )(x2d, wqkv, bqkv, wo, bo)

    return out2d.reshape(B, N, output_dim)


def _reference(combined_data, params, *, n_heads, output_dim):
    """Pure-JAX reference matching the PyTorch forward exactly."""
    wq, bq, wk, bk, wv, bv, wo, bo = params
    B, N, _ = combined_data.shape
    q = combined_data @ wq + bq[0]
    k = combined_data @ wk + bk[0]
    v = combined_data @ wv + bv[0]
    q = q.reshape(B, N, n_heads, output_dim)
    k = k.reshape(B, N, n_heads, output_dim)
    v = v.reshape(B, N, n_heads, output_dim)
    scores = jnp.einsum('bnhq,bmhq->bhnm', q, k)
    weights = jax.nn.softmax(scores / (output_dim ** 0.5), axis=-1)
    wv_out = jnp.einsum('bhnm,bmhq->bnhq', weights, v)
    wv_out = wv_out.reshape(B, N, n_heads * output_dim)
    return wv_out @ wo + bo[0]


def _init_params(key, input_dim, output_dim, n_heads):
    """Deterministic synthetic parameters (same shapes as the PyTorch module)."""
    two_in = input_dim * 2
    hd = output_dim * n_heads
    ks = jax.random.split(key, 8)
    s_in = 1.0 / (two_in ** 0.5)
    s_hd = 1.0 / (hd ** 0.5)
    wq = jax.random.uniform(ks[0], (two_in, hd), jnp.float32, -s_in, s_in)
    bq = jax.random.uniform(ks[1], (1, hd), jnp.float32, -s_in, s_in)
    wk = jax.random.uniform(ks[2], (two_in, hd), jnp.float32, -s_in, s_in)
    bk = jax.random.uniform(ks[3], (1, hd), jnp.float32, -s_in, s_in)
    wv = jax.random.uniform(ks[4], (two_in, hd), jnp.float32, -s_in, s_in)
    bv = jax.random.uniform(ks[5], (1, hd), jnp.float32, -s_in, s_in)
    wo = jax.random.uniform(ks[6], (hd, output_dim), jnp.float32, -s_hd, s_hd)
    bo = jax.random.uniform(ks[7], (1, output_dim), jnp.float32, -s_hd, s_hd)
    return (wq, bq, wk, bk, wv, bv, wo, bo)


if __name__ == "__main__":
    input_dim = 32
    output_dim = 32
    n_heads = 4
    batch = 2
    seq = 8

    key = jax.random.PRNGKey(0)
    k_x, k_p = jax.random.split(key)
    combined_data = jax.random.normal(
        k_x, (batch, seq, input_dim * 2), dtype=jnp.float32)
    params = _init_params(k_p, input_dim, output_dim, n_heads)

    ref = _reference(combined_data, params, n_heads=n_heads,
                     output_dim=output_dim)

    out = partclipseg_concat_self_attention(
        combined_data, params, n_heads=n_heads, output_dim=output_dim)
    out = jax.block_until_ready(out)
    assert out.shape == (batch, seq, output_dim)
    assert jnp.allclose(out, ref, atol=2e-3, rtol=2e-3), (
        float(jnp.max(jnp.abs(out - ref))))

    print("KERNEL_OK")
</pallas_src>

<mosaic_0001>
module attributes {stable_mosaic.version = 11 : i64} {
  func.func @_attn_kernel(%arg0: i32, %arg1: memref<16x64xf32, #tpu.memory_space<vmem>>, %arg2: memref<64x384xf32, #tpu.memory_space<vmem>>, %arg3: memref<1x384xf32, #tpu.memory_space<vmem>>, %arg4: memref<128x32xf32, #tpu.memory_space<vmem>>, %arg5: memref<1x32xf32, #tpu.memory_space<vmem>>, %arg6: memref<16x32xf32, #tpu.memory_space<vmem>>) attributes {dimension_semantics = [#tpu.dimension_semantics<parallel>], iteration_bounds = array<i64: 1>, scalar_prefetch = 0 : i64, scratch_operands = 0 : i64, tpu.core_type = #tpu.core_type<tc>, window_params = [{transform_indices = @transform_0, window_bounds = array<i64: 16, 64>}, {pipeline_mode = #tpu.pipeline_mode<synchronous>, transform_indices = @transform_1, window_bounds = array<i64: 64, 384>}, {pipeline_mode = #tpu.pipeline_mode<synchronous>, transform_indices = @transform_2, window_bounds = array<i64: 1, 384>}, {pipeline_mode = #tpu.pipeline_mode<synchronous>, transform_indices = @transform_3, window_bounds = array<i64: 128, 32>}, {pipeline_mode = #tpu.pipeline_mode<synchronous>, transform_indices = @transform_4, window_bounds = array<i64: 1, 32>}, {transform_indices = @transform_5, window_bounds = array<i64: 16, 32>}]} {
    %c0 = arith.constant 0 : index
    %c0_0 = arith.constant 0 : index
    %0 = vector.load %arg1[%c0, %c0_0] : memref<16x64xf32, #tpu.memory_space<vmem>>, vector<16x64xf32>
    %c0_1 = arith.constant 0 : index
    %c0_2 = arith.constant 0 : index
    %1 = vector.load %arg2[%c0_1, %c0_2] : memref<64x384xf32, #tpu.memory_space<vmem>>, vector<64x384xf32>
    %cst = arith.constant dense<0.000000e+00> : vector<16x384xf32>
    %2 = tpu.matmul %0, %1, %cst {dimension_numbers = #tpu.dot_dimension_numbers<[1], [0], [0], [1], [0, 0, 1, 1], [], []>} : vector<16x64xf32>, vector<64x384xf32>, vector<16x384xf32> -> vector<16x384xf32>
    %c0_3 = arith.constant 0 : index
    %c0_4 = arith.constant 0 : index
    %3 = vector.load %arg3[%c0_3, %c0_4] : memref<1x384xf32, #tpu.memory_space<vmem>>, vector<1x384xf32>
    %4 = vector.broadcast %3 : vector<1x384xf32> to vector<16x384xf32>
    %5 = arith.addf %2, %4 : vector<16x384xf32>
    %6 = vector.extract_strided_slice %5 {offsets = [0, 0], sizes = [16, 128], strides = [1, 1]} : vector<16x384xf32> to vector<16x128xf32>
    %7 = vector.shape_cast %6 : vector<16x128xf32> to vector<2x8x128xf32>
    %8 = vector.extract_strided_slice %5 {offsets = [0, 128], sizes = [16, 128], strides = [1, 1]} : vector<16x384xf32> to vector<16x128xf32>
    %9 = vector.shape_cast %8 : vector<16x128xf32> to vector<2x8x128xf32>
    %10 = vector.extract_strided_slice %5 {offsets = [0, 256], sizes = [16, 128], strides = [1, 1]} : vector<16x384xf32> to vector<16x128xf32>
    %11 = vector.shape_cast %10 : vector<16x128xf32> to vector<2x8x128xf32>
    %12 = vector.extract_strided_slice %7 {offsets = [0, 0, 0], sizes = [2, 8, 32], strides = [1, 1, 1]} : vector<2x8x128xf32> to vector<2x8x32xf32>
    %13 = vector.extract_strided_slice %9 {offsets = [0, 0, 0], sizes = [2, 8, 32], strides = [1, 1, 1]} : vector<2x8x128xf32> to vector<2x8x32xf32>
    %14 = vector.extract_strided_slice %11 {offsets = [0, 0, 0], sizes = [2, 8, 32], strides = [1, 1, 1]} : vector<2x8x128xf32> to vector<2x8x32xf32>
    "tpu.trace_start"() <{level = 10 : i32, message = "bqd,bkd->bqk"}> : () -> ()
    %cst_5 = arith.constant dense<0.000000e+00> : vector<2x8x8xf32>
    %15 = tpu.matmul %12, %13, %cst_5 {dimension_numbers = #tpu.dot_dimension_numbers<[2], [2], [1], [1], [0, 0, 0, 1, 1, 1], [0], [0]>} : vector<2x8x32xf32>, vector<2x8x32xf32>, vector<2x8x8xf32> -> vector<2x8x8xf32>
    "tpu.trace_stop"() : () -> ()
    %cst_6 = arith.constant dense<0xFF800000> : vector<2x8xf32>
    %16 = vector.multi_reduction <maximumf>, %15, %cst_6 [2] : vector<2x8x8xf32> to vector<2x8xf32>
    %17 = vector.shape_cast %16 : vector<2x8xf32> to vector<2x8x1xf32>
    %18 = vector.broadcast %17 : vector<2x8x1xf32> to vector<2x8x8xf32>
    %19 = arith.subf %15, %18 : vector<2x8x8xf32>
    %20 = math.exp %19 : vector<2x8x8xf32>
    %cst_7 = arith.constant dense<0.000000e+00> : vector<2x8xf32>
    %21 = vector.multi_reduction <add>, %20, %cst_7 [2] : vector<2x8x8xf32> to vector<2x8xf32>
    %22 = vector.shape_cast %21 : vector<2x8xf32> to vector<2x8x1xf32>
    %23 = tpu.reciprocal %22 : vector<2x8x1xf32> -> vector<2x8x1xf32>
    %24 = vector.broadcast %23 : vector<2x8x1xf32> to vector<2x8x8xf32>
    %25 = arith.mulf %20, %24 : vector<2x8x8xf32>
    "tpu.trace_start"() <{level = 10 : i32, message = "bqk,bkd->bqd"}> : () -> ()
    %cst_8 = arith.constant dense<0.000000e+00> : vector<2x8x32xf32>
    %26 = tpu.matmul %25, %14, %cst_8 {dimension_numbers = #tpu.dot_dimension_numbers<[2], [1], [1], [2], [0, 0, 0, 1, 1, 2], [0], [0]>} : vector<2x8x8xf32>, vector<2x8x32xf32>, vector<2x8x32xf32> -> vector<2x8x32xf32>
    "tpu.trace_stop"() : () -> ()
    %27 = vector.extract_strided_slice %7 {offsets = [0, 0, 32], sizes = [2, 8, 32], strides = [1, 1, 1]} : vector<2x8x128xf32> to vector<2x8x32xf32>
    %28 = vector.extract_strided_slice %9 {offsets = [0, 0, 32], sizes = [2, 8, 32], strides = [1, 1, 1]} : vector<2x8x128xf32> to vector<2x8x32xf32>
    %29 = vector.extract_strided_slice %11 {offsets = [0, 0, 32], sizes = [2, 8, 32], strides = [1, 1, 1]} : vector<2x8x128xf32> to vector<2x8x32xf32>
    "tpu.trace_start"() <{level = 10 : i32, message = "bqd,bkd->bqk"}> : () -> ()
    %cst_9 = arith.constant dense<0.000000e+00> : vector<2x8x8xf32>
    %30 = tpu.matmul %27, %28, %cst_9 {dimension_numbers = #tpu.dot_dimension_numbers<[2], [2], [1], [1], [0, 0, 0, 1, 1, 1], [0], [0]>} : vector<2x8x32xf32>, vector<2x8x32xf32>, vector<2x8x8xf32> -> vector<2x8x8xf32>
    "tpu.trace_stop"() : () -> ()
    %cst_10 = arith.constant dense<0xFF800000> : vector<2x8xf32>
    %31 = vector.multi_reduction <maximumf>, %30, %cst_10 [2] : vector<2x8x8xf32> to vector<2x8xf32>
    %32 = vector.shape_cast %31 : vector<2x8xf32> to vector<2x8x1xf32>
    %33 = vector.broadcast %32 : vector<2x8x1xf32> to vector<2x8x8xf32>
    %34 = arith.subf %30, %33 : vector<2x8x8xf32>
    %35 = math.exp %34 : vector<2x8x8xf32>
    %cst_11 = arith.constant dense<0.000000e+00> : vector<2x8xf32>
    %36 = vector.multi_reduction <add>, %35, %cst_11 [2] : vector<2x8x8xf32> to vector<2x8xf32>
    %37 = vector.shape_cast %36 : vector<2x8xf32> to vector<2x8x1xf32>
    %38 = tpu.reciprocal %37 : vector<2x8x1xf32> -> vector<2x8x1xf32>
    %39 = vector.broadcast %38 : vector<2x8x1xf32> to vector<2x8x8xf32>
    %40 = arith.mulf %35, %39 : vector<2x8x8xf32>
    "tpu.trace_start"() <{level = 10 : i32, message = "bqk,bkd->bqd"}> : () -> ()
    %cst_12 = arith.constant dense<0.000000e+00> : vector<2x8x32xf32>
    %41 = tpu.matmul %40, %29, %cst_12 {dimension_numbers = #tpu.dot_dimension_numbers<[2], [1], [1], [2], [0, 0, 0, 1, 1, 2], [0], [0]>} : vector<2x8x8xf32>, vector<2x8x32xf32>, vector<2x8x32xf32> -> vector<2x8x32xf32>
    "tpu.trace_stop"() : () -> ()
    %42 = vector.extract_strided_slice %7 {offsets = [0, 0, 64], sizes = [2, 8, 32], strides = [1, 1, 1]} : vector<2x8x128xf32> to vector<2x8x32xf32>
    %43 = vector.extract_strided_slice %9 {offsets = [0, 0, 64], sizes = [2, 8, 32], strides = [1, 1, 1]} : vector<2x8x128xf32> to vector<2x8x32xf32>
    %44 = vector.extract_strided_slice %11 {offsets = [0, 0, 64], sizes = [2, 8, 32], strides = [1, 1, 1]} : vector<2x8x128xf32> to vector<2x8x32xf32>
    "tpu.trace_start"() <{level = 10 : i32, message = "bqd,bkd->bqk"}> : () -> ()
    %cst_13 = arith.constant dense<0.000000e+00> : vector<2x8x8xf32>
    %45 = tpu.matmul %42, %43, %cst_13 {dimension_numbers = #tpu.dot_dimension_numbers<[2], [2], [1], [1], [0, 0, 0, 1, 1, 1], [0], [0]>} : vector<2x8x32xf32>, vector<2x8x32xf32>, vector<2x8x8xf32> -> vector<2x8x8xf32>
    "tpu.trace_stop"() : () -> ()
    %cst_14 = arith.constant dense<0xFF800000> : vector<2x8xf32>
    %46 = vector.multi_reduction <maximumf>, %45, %cst_14 [2] : vector<2x8x8xf32> to vector<2x8xf32>
    %47 = vector.shape_cast %46 : vector<2x8xf32> to vector<2x8x1xf32>
    %48 = vector.broadcast %47 : vector<2x8x1xf32> to vector<2x8x8xf32>
    %49 = arith.subf %45, %48 : vector<2x8x8xf32>
    %50 = math.exp %49 : vector<2x8x8xf32>
    %cst_15 = arith.constant dense<0.000000e+00> : vector<2x8xf32>
    %51 = vector.multi_reduction <add>, %50, %cst_15 [2] : vector<2x8x8xf32> to vector<2x8xf32>
    %52 = vector.shape_cast %51 : vector<2x8xf32> to vector<2x8x1xf32>
    %53 = tpu.reciprocal %52 : vector<2x8x1xf32> -> vector<2x8x1xf32>
    %54 = vector.broadcast %53 : vector<2x8x1xf32> to vector<2x8x8xf32>
    %55 = arith.mulf %50, %54 : vector<2x8x8xf32>
    "tpu.trace_start"() <{level = 10 : i32, message = "bqk,bkd->bqd"}> : () -> ()
    %cst_16 = arith.constant dense<0.000000e+00> : vector<2x8x32xf32>
    %56 = tpu.matmul %55, %44, %cst_16 {dimension_numbers = #tpu.dot_dimension_numbers<[2], [1], [1], [2], [0, 0, 0, 1, 1, 2], [0], [0]>} : vector<2x8x8xf32>, vector<2x8x32xf32>, vector<2x8x32xf32> -> vector<2x8x32xf32>
    "tpu.trace_stop"() : () -> ()
    %57 = vector.extract_strided_slice %7 {offsets = [0, 0, 96], sizes = [2, 8, 32], strides = [1, 1, 1]} : vector<2x8x128xf32> to vector<2x8x32xf32>
    %58 = vector.extract_strided_slice %9 {offsets = [0, 0, 96], sizes = [2, 8, 32], strides = [1, 1, 1]} : vector<2x8x128xf32> to vector<2x8x32xf32>
    %59 = vector.extract_strided_slice %11 {offsets = [0, 0, 96], sizes = [2, 8, 32], strides = [1, 1, 1]} : vector<2x8x128xf32> to vector<2x8x32xf32>
    "tpu.trace_start"() <{level = 10 : i32, message = "bqd,bkd->bqk"}> : () -> ()
    %cst_17 = arith.constant dense<0.000000e+00> : vector<2x8x8xf32>
    %60 = tpu.matmul %57, %58, %cst_17 {dimension_numbers = #tpu.dot_dimension_numbers<[2], [2], [1], [1], [0, 0, 0, 1, 1, 1], [0], [0]>} : vector<2x8x32xf32>, vector<2x8x32xf32>, vector<2x8x8xf32> -> vector<2x8x8xf32>
    "tpu.trace_stop"() : () -> ()
    %cst_18 = arith.constant dense<0xFF800000> : vector<2x8xf32>
    %61 = vector.multi_reduction <maximumf>, %60, %cst_18 [2] : vector<2x8x8xf32> to vector<2x8xf32>
    %62 = vector.shape_cast %61 : vector<2x8xf32> to vector<2x8x1xf32>
    %63 = vector.broadcast %62 : vector<2x8x1xf32> to vector<2x8x8xf32>
    %64 = arith.subf %60, %63 : vector<2x8x8xf32>
    %65 = math.exp %64 : vector<2x8x8xf32>
    %cst_19 = arith.constant dense<0.000000e+00> : vector<2x8xf32>
    %66 = vector.multi_reduction <add>, %65, %cst_19 [2] : vector<2x8x8xf32> to vector<2x8xf32>
    %67 = vector.shape_cast %66 : vector<2x8xf32> to vector<2x8x1xf32>
    %68 = tpu.reciprocal %67 : vector<2x8x1xf32> -> vector<2x8x1xf32>
    %69 = vector.broadcast %68 : vector<2x8x1xf32> to vector<2x8x8xf32>
    %70 = arith.mulf %65, %69 : vector<2x8x8xf32>
    "tpu.trace_start"() <{level = 10 : i32, message = "bqk,bkd->bqd"}> : () -> ()
    %cst_20 = arith.constant dense<0.000000e+00> : vector<2x8x32xf32>
    %71 = tpu.matmul %70, %59, %cst_20 {dimension_numbers = #tpu.dot_dimension_numbers<[2], [1], [1], [2], [0, 0, 0, 1, 1, 2], [0], [0]>} : vector<2x8x8xf32>, vector<2x8x32xf32>, vector<2x8x32xf32> -> vector<2x8x32xf32>
    "tpu.trace_stop"() : () -> ()
    %72 = tpu.concatenate %26, %41, %56, %71 in 2 : vector<2x8x32xf32>, vector<2x8x32xf32>, vector<2x8x32xf32>, vector<2x8x32xf32> -> vector<2x8x128xf32>
    %73 = vector.shape_cast %72 : vector<2x8x128xf32> to vector<16x128xf32>
    %c0_21 = arith.constant 0 : index
    %c0_22 = arith.constant 0 : index
    %74 = vector.load %arg4[%c0_21, %c0_22] : memref<128x32xf32, #tpu.memory_space<vmem>>, vector<128x32xf32>
    %cst_23 = arith.constant dense<0.000000e+00> : vector<16x32xf32>
    %75 = tpu.matmul %73, %74, %cst_23 {dimension_numbers = #tpu.dot_dimension_numbers<[1], [0], [0], [1], [0, 0, 1, 1], [], []>} : vector<16x128xf32>, vector<128x32xf32>, vector<16x32xf32> -> vector<16x32xf32>
    %c0_24 = arith.constant 0 : index
    %c0_25 = arith.constant 0 : index
    %76 = vector.load %arg5[%c0_24, %c0_25] : memref<1x32xf32, #tpu.memory_space<vmem>>, vector<1x32xf32>
    %77 = vector.broadcast %76 : vector<1x32xf32> to vector<16x32xf32>
    %78 = arith.addf %75, %77 : vector<16x32xf32>
    %c0_26 = arith.constant 0 : index
    %c0_27 = arith.constant 0 : index
    %79 = vector.load %arg6[%c0_26, %c0_27] : memref<16x32xf32, #tpu.memory_space<vmem>>, vector<16x32xf32>
    tpu.vector_store %arg6[%c0_26, %c0_27], %78 {strides = array<i32>} : memref<16x32xf32, #tpu.memory_space<vmem>>, vector<16x32xf32>,
    return
  }
  func.func @transform_0(%arg0: i32) -> (i32, i32) {
    %c0_i32 = arith.constant 0 : i32
    %c0_i32_0 = arith.constant 0 : i32
    return %arg0, %c0_i32 : i32, i32
  }
  func.func @transform_1(%arg0: i32) -> (i32, i32) {
    %c0_i32 = arith.constant 0 : i32
    %c0_i32_0 = arith.constant 0 : i32
    %c0_i32_1 = arith.constant 0 : i32
    return %c0_i32, %c0_i32_0 : i32, i32
  }
  func.func @transform_2(%arg0: i32) -> (i32, i32) {
    %c0_i32 = arith.constant 0 : i32
    %c0_i32_0 = arith.constant 0 : i32
    %c0_i32_1 = arith.constant 0 : i32
    return %c0_i32, %c0_i32_0 : i32, i32
  }
  func.func @transform_3(%arg0: i32) -> (i32, i32) {
    %c0_i32 = arith.constant 0 : i32
    %c0_i32_0 = arith.constant 0 : i32
    %c0_i32_1 = arith.constant 0 : i32
    return %c0_i32, %c0_i32_0 : i32, i32
  }
  func.func @transform_4(%arg0: i32) -> (i32, i32) {
    %c0_i32 = arith.constant 0 : i32
    %c0_i32_0 = arith.constant 0 : i32
    %c0_i32_1 = arith.constant 0 : i32
    return %c0_i32, %c0_i32_0 : i32, i32
  }
  func.func @transform_5(%arg0: i32) -> (i32, i32) {
    %c0_i32 = arith.constant 0 : i32
    %c0_i32_0 = arith.constant 0 : i32
    return %arg0, %c0_i32 : i32, i32
  }
}

</mosaic_0001>

<bundles_post_ra>
// kernel: tpu_custom_call.1
= control target key start
LH: loop header
LB: loop body
LE: loop exit
PB: predicated region body
PF: predicated region fallthrough
CT: control target
= control target key end

     0   :  { %10 = vsyncpa [#allocation3], 0  ;;  %s2389_s0 = inlined_call_operand.vmem [shape: f32[16,64], index: 0, kind: input, shape index: {}]   ;;  %s2390_s1 = inlined_call_operand.hbm [shape: f32[64,384], index: 1, kind: input, shape index: {}]   ;;  %s2391_s2 = inlined_call_operand.vmem [shape: f32[1,384], index: 2, kind: input, shape index: {}]   ;;  %s2392_s3 = inlined_call_operand.vmem [shape: f32[128,32], index: 3, kind: input, shape index: {}]   ;;  %s2393_s4 = inlined_call_operand.vmem [shape: f32[1,32], index: 4, kind: input, shape index: {}]   ;;  %s2394_s5 = inlined_call_operand.hbm [shape: f32[16,32], index: 5, kind: output, shape index: {}]  }
   0x1   :  { %11 = vsyncpa [#allocation4], 0  ;;  %s2092_s18 = smov [#allocation2]   ;;  %s2044_s22 = scalar_lea.hbm %s2390_s1, 3072 }
   0x2   :  { %s19_s19 = sshll.u32 %s2092_s18, 4  ;;  %p2045_p0 = scmp.ne.s32.totalorder %s2390_s1, %s2044_s22  ;;  %s20_s19 = int_to_ptr.vmem [resolvable:$true] %s19_s19 }
   0x3   :  { %p2048_p1 = scmp.lt.u32.totalorder %s2044_s22, %s2390_s1 }
   0x5   :  { %p2050_p2 = pnand %p2048_p1, %p2045_p0 }
   0x7   :  { %2053 = shalt.err (!%p2050_p2)
}
   0x8   :  { %s2054_s27 = scalar_lea.vmem %s20_s19, 3072  ;;  %p2059_p4 = scmp.lt.s32.totalorder %s20_s19, %s20_s19 }
   0x9   :  { %p2055_p3 = scmp.ne.s32.totalorder %s20_s19, %s2054_s27  ;;  %p2060_p5 = scmp.lt.s32.totalorder %s2054_s27, %s2054_s27 }
   0xb   :  { %p2061_p6 = por %p2060_p5, %p2059_p4 }
   0xd   :  { %p2062_p7 = pnand %p2061_p6, %p2055_p3 }
   0xf   :  { %2065 = shalt.err (!%p2062_p7)
}
  0x10   :  { %s2093_s28 = smov 384   ;;  %s2094_s29 = smov 24  }
  0x11   :  { %25 = dma.hbm_to_vmem [thread:$0]  %s2390_s1, 3072, %s20_s19, [#allocation3], %s2093_s28, %s2093_s28, %s2094_s29  }
  0x12   :  { %2088 = dma.done.wait [#allocation3], 3072  }
  0x13   :  { %2089 = vsyncadd [#allocation3], 4294964224  ;;  %v2095_v0 = vmov 0.0   ;;  %v38_v1 = vld [vmem:[#allocation2 + $0x8] sm:$0xff]  ;;  %v41_v2 = vld [vmem:[#allocation2 + $0x20] sm:$0xff]  ;;  %vm78_vm0 = vcmask 523264   ;;  %v63_v39 = vlaneseq }
  0x14   :  { %149 = vmatprep.mubr.f32.mxu0 %v2095_v0  ;;  %1807 = vmatprep.subr.mxu1 %v2095_v0  ;;  %v37_v3 = vld [vmem:[#allocation2] sm:$0xff]  ;;  %v1922_v4 = vpack.c.bf16 %v41_v2, %v38_v1  ;;  %v40_v5 = vld [vmem:[#allocation2 + $0x18] sm:$0xff]  ;;  %v47_v7 = vld [vmem:[#allocation2 + $0x50] sm:$0xff]  ;;  %vm2096_vm1 = vmmov 0   ;;  %vm237_vm2 = vcmask 261120   ;;  %vm390_vm3 = vcmask 64512  }
  0x15   :  { %v44_v6 = vld [vmem:[#allocation2 + $0x38] sm:$0xff]  ;;  %v1924_v8 = vpack.c.bf16 %v40_v5, %v37_v3  ;;  %v43_v10 = vld [vmem:[#allocation2 + $0x30] sm:$0xff]  ;;  %v46_v11 = vld [vmem:[#allocation2 + $0x48] sm:$0xff]  ;;  %1809 = vmatprep.mubr.msk.f32.mxu1 %vm2096_vm1, %v2095_v0  ;;  %v64_v40 = vshrl.u32 %v63_v39, 7  ;;  %s2098_s11 = smov 64   ;;  %s2099_s12 = smov 32  }
  0x16   :  { %v1926_v9 = vpack.c.bf16 %v47_v7, %v44_v6  ;;  %v50_v12 = vld [vmem:[#allocation2 + $0x68] sm:$0xff]  ;;  %1923 = vmatprep.subr.bf16.mxu0 %v1922_v4  ;;  %v53_v13 = vld [vmem:[#allocation2 + $0x80] sm:$0xff]  ;;  %v1928_v14 = vpack.c.bf16 %v46_v11, %v43_v10  ;;  %v52_v17 = vld [vmem:[#allocation2 + $0x78] sm:$0xff]  ;;  %vm1579_vm4 = vcmask 785408   ;;  %s2100_s18 = smov [#allocation5]  }
  0x17   :  { %1925 = vmatpush1.bf16.msra.mxu0 %v1924_v8  ;;  %v1930_v15 = vpack.c.bf16 %v53_v13, %v50_v12  ;;  %v49_v16 = vld [vmem:[#allocation2 + $0x60] sm:$0xff]  ;;  %v56_v18 = vld [vmem:[#allocation2 + $0x98] sm:$0xff]  ;;  %v59_v19 = vld [vmem:[#allocation2 + $0xb0] sm:$0xff]  ;;  %v69_v41 = vsub.s32 1, %v64_v40  ;;  %v65_v43 = vsub.s32 0, %v64_v40  ;;  %v73_v54 = vsub.s32 2, %v64_v40 }
  0x18   :  { %1927 = vmatprep.subr.bf16.mxu0 %v1926_v9  ;;  %v1932_v20 = vpack.c.bf16 %v52_v17, %v49_v16  ;;  %v1934_v21 = vpack.c.bf16 %v59_v19, %v56_v18  ;;  %v55_v22 = vld [vmem:[#allocation2 + $0x90] sm:$0xff]  ;;  %v58_v23 = vld [vmem:[#allocation2 + $0xa8] sm:$0xff]  ;;  %v45_v28 = vld [vmem:[#allocation2 + $0x40] sm:$0xff]  ;;  %s1687_s19 = sshll.u32 %s2100_s18, 4  ;;  %s1688_s19 = int_to_ptr.vmem [resolvable:$true] %s1687_s19 }
  0x19   :  { %v39_v24 = vld [vmem:[#allocation2 + $0x10] sm:$0xff]  ;;  %v42_v25 = vld [vmem:[#allocation2 + $0x28] sm:$0xff]  ;;  %v1936_v26 = vpack.c.bf16 %v58_v23, %v55_v22  ;;  %v48_v29 = vld [vmem:[#allocation2 + $0x58] sm:$0xff]  ;;  %s2066_s20 = scalar_lea.vmem %s1688_s19, 256  ;;  %p2071_p9 = scmp.lt.s32.totalorder %s1688_s19, %s1688_s19 }
  0x1a   :  { %v1938_v27 = vpack.c.bf16 %v42_v25, %v39_v24  ;;  %v35_v30 = vld [vmem:[%s2389_s0] sm:$0xff]  ;;  %v1942_v31 = vpack.c.bf16 %v48_v29, %v45_v28  ;;  %v51_v32 = vld [vmem:[#allocation2 + $0x70] sm:$0xff]  ;;  %v54_v33 = vld [vmem:[#allocation2 + $0x88] sm:$0xff]  ;;  %p2067_p8 = scmp.ne.s32.totalorder %s1688_s19, %s2066_s20  ;;  %p2072_p10 = scmp.lt.s32.totalorder %s2066_s20, %s2066_s20 }
  0x1b   :  { %1929 = vmatpush1.bf16.msra.mxu0 %v1928_v14  ;;  %v36_v34 = vld [vmem:[%s2389_s0 + $0x8] sm:$0xff]  ;;  %v1946_v35 = vpack.c.bf16 %v54_v33, %v51_v32  ;;  %v57_v36 = vld [vmem:[#allocation2 + $0xa0] sm:$0xff]  ;;  %v60_v37 = vld [vmem:[#allocation2 + $0xb8] sm:$0xff] }
  0x1c   :  { %1931 = vmatprep.subr.bf16.mxu0 %v1930_v15  ;;  %v1950_v38 = vpack.c.bf16 %v60_v37, %v57_v36  ;;  %v61_v42 = vld [vmem:[%s2391_s2] sm:$0x7]  ;;  %s2097_s2 = smov 96   ;;  %p2073_p11 = por %p2072_p10, %p2071_p9 }
  0x1d   :  { %v70_v44 = vrot.slane %v61_v42, %v69_v41  ;;  %v66_v46 = vrot.slane %v61_v42, %v65_v43  ;;  %v74_v55 = vrot.slane %v61_v42, %v73_v54 }
  0x1e   :  { %p2074_p12 = pnand %p2073_p11, %p2067_p8 }
  0x1f   :  { %1933 = vmatpush1.bf16.msra.mxu0 %v1932_v20 }
  0x20   :  { %1935 = vmatprep.subr.bf16.mxu0 %v1934_v21 }
  0x23   :  { %1937 = vmatpush1.bf16.msra.mxu0 %v1936_v26 }
  0x24   :  { %1939 = vmatprep.subr.bf16.mxu0 %v1938_v27 }
  0x26   :  { %1699 = vmatmul.mubr.msk.f32.vlgmr.msra.gmra.mrb[0].mxu0 %vm78_vm0, %v35_v30 }
  0x27   :  { %155 = vmatprep.mubr.f32.mxu0 %v2095_v0  ;;  %1941 = vmatpush3.bf16.msra.mxu0 %v1938_v27 }
  0x28   :  { %1943 = vmatprep.subr.bf16.mxu0 %v1942_v31 }
  0x2a   :  { %1700 = vmatmul.mubr.msk.f32.gmra.mrb[2].mxu0 %vm78_vm0, %v36_v34 }
  0x2b   :  { %1945 = vmatpush3.bf16.msra.mxu0 %v1942_v31  ;;  %1804 = vmatprep.mubr.msk.f32.mxu0 %vm78_vm0, %v35_v30 }
  0x2c   :  { %1947 = vmatprep.subr.bf16.mxu0 %v1946_v35 }
  0x2f   :  { %1949 = vmatpush3.bf16.msra.mxu0 %v1946_v35 }
  0x30   :  { %1951 = vmatprep.subr.bf16.mxu0 %v1950_v38 }
  0x33   :  { %1953 = vmatpush3.bf16.msra.mxu0 %v1950_v38 }
  0x34   :  { %1812 = vmatprep.subr.mxu0 %v2095_v0 }
  0x36   :  { %1805 = vmatmul.mubr.msk.f32.vlgmr.msra.gmra.mrb[4].mxu0 %vm78_vm0, %v36_v34 }
  0x37   :  { %1814 = vmatprep.mubr.msk.f32.mxu0 %vm2096_vm1, %v2095_v0 }
  0xf9   :  { %v151_v45 = vpop.f32.mrb[0].mxu0 }
  0xfa   :  { %v153_v47 = vpop.f32.mrb[1].mxu0  ;;  %v2170_v50 = vadd.f32 %v151_v45, %v66_v46 }
  0xfb   :  { %v2166_v48 = vadd.f32 %v153_v47, %v70_v44 }
  0xfd   :  { %v157_v49 = vpop.f32.mrb[2].mxu0  ;;  %1808 = vmatpush3.xpose.msk.msra.mxu1 %vm237_vm2, %v2166_v48 }
  0xfe   :  { %v159_v51 = vpop.f32.mrb[3].mxu0  ;;  %1817 = vmatprep.subr.mxu1 %v2095_v0  ;;  %v2181_v53 = vadd.f32 %v157_v49, %v66_v46 }
  0xff   :  { %v2173_v52 = vadd.f32 %v159_v51, %v70_v44 }
 0x100   :  { %1810 = vmatmul.mubr.msk.f32.vlgmr.msra.gmra.mrb[0].mxu1 %vm237_vm2, %v2170_v50 }
 0x101   :  { %639 = vrot.lane.b32.xlu1 %v2173_v52, %s2097_s2  ;;  %1813 = vmatpush3.xpose.msk.msra.mxu0 %vm237_vm2, %v2173_v52 }
 0x102   :  { %1822 = vmatprep.subr.mxu0 %v2095_v0  ;;  %1819 = vmatprep.mubr.msk.f32.mxu1 %vm2096_vm1, %v2095_v0 }
 0x104   :  { %1815 = vmatmul.mubr.msk.f32.vlgmr.msra.gmra.mrb[6].mxu0 %vm237_vm2, %v2181_v53 }
 0x105   :  { %559 = vrot.lane.b32.xlu1 %v2170_v50, %s2097_s2  ;;  %1824 = vmatprep.mubr.msk.f32.mxu0 %vm2096_vm1, %v2095_v0 }
 0x109   :  { %v1806_v56 = vpop.f32.mrb[4].mxu0 }
 0x10a   :  { %v2192_v57 = vadd.f32 %v1806_v56, %v74_v55  ;;  %v228_v58 = vpop.f32.mrb[5].mxu0 }
 0x10b   :  { %v2196_v59 = vadd.f32 %v228_v58, %v74_v55 }
 0x10c   :  { %1823 = vmatpush3.msra.mxu0 %v2192_v57 }
 0x10d   :  { %1832 = vmatprep.subr.mxu0 %v2095_v0  ;;  %1818 = vmatpush3.msra.mxu1 %v2196_v59 }
 0x10e   :  { %1827 = vmatprep.subr.mxu1 %v2095_v0 }
 0x173   :  { %v640_v13 = vpop.permute.xlu1 %639 }
 0x177   :  { %v560_v14 = vpop.permute.xlu1 %559 }
 0x1d3   :  { %v310_v60 = vpop.f32.mrb[0].mxu1 }
 0x1d4   :  { %v1811_v61 = vpop.f32.mrb[1].mxu1  ;;  %v391_v62 = vsel %vm390_vm3, %v310_v60, -inf }
 0x1d5   :  { %392 = vmax.xlane.f32.xlu0 %v391_v62 }
 0x1d7   :  { %v386_v63 = vpop.f32.mrb[6].mxu0 }
 0x1d8   :  { %v1816_v1 = vpop.f32.mrb[7].mxu0  ;;  %v394_v2 = vsel %vm390_vm3, %v386_v63, -inf }
 0x1d9   :  { %395 = vmax.xlane.f32.xlu0 %v394_v2 }
 0x1ef   :  { %561 = vrot.lane.b32.xlu0 %v2166_v48, %s2097_s2 }
 0x262   :  { %v393_v3 = vpop.xlane.xlu0 %392 }
 0x263   :  { %v397_v4 = vsub.f32 %v310_v60, %v393_v3 }
 0x265   :  { %v399_v5 = vmul.f32 1.442695, %v397_v4 }
 0x266   :  { %v396_v6 = vpop.xlane.xlu0 %395 }
 0x267   :  { %2012 = vpow2.f32 %v399_v5  ;;  %v398_v7 = vsub.f32 %v386_v63, %v396_v6 }
 0x269   :  { %v401_v8 = vmul.f32 1.442695, %v398_v7 }
 0x26a   :  { %v562_v19 = vpop.permute.xlu0 %561 }
 0x26b   :  { %2014 = vpow2.f32 %v401_v8 }
 0x271   :  { %v2013_v9 = vpop.eup %2012 }
 0x272   :  { %v403_v10 = vsel %vm390_vm3, %v2013_v9, 0.0 }
 0x273   :  { %404 = vadd.xlane.f32.xlu1 %v403_v10 }
 0x275   :  { %v2015_v11 = vpop.eup %2014 }
 0x276   :  { %v406_v12 = vsel %vm390_vm3, %v2015_v11, 0.0 }
 0x277   :  { %407 = vadd.xlane.f32.xlu1 %v406_v12 }
 0x288   :  { %637 = vrot.lane.b32.xlu1 %v2181_v53, %s2097_s2 }
 0x300   :  { %v405_v15 = vpop.xlane.xlu1 %404 }
 0x301   :  { %2016 = vrcp.f32 %v405_v15 }
 0x304   :  { %v408_v16 = vpop.xlane.xlu1 %407 }
 0x305   :  { %2018 = vrcp.f32 %v408_v16 }
 0x308   :  { %v638_v22 = vpop.permute.xlu1 %637 }
 0x30b   :  { %v2017_v17 = vpop.eup %2016 }
 0x30c   :  { %v411_v18 = vmul.f32 %v2017_v17, %v2013_v9 }
 0x30e   :  { %1820 = vmatmul.mubr.msk.f32.vlgmr.msra.gmra.mrb[2].mxu1 %vm390_vm3, %v411_v18 }
 0x30f   :  { %v2019_v20 = vpop.eup %2018  ;;  %1828 = vmatpush3.xpose.msk.msra.mxu1 %vm237_vm2, %v562_v19  ;;  %1829 = vmatprep.mubr.msk.f32.mxu1 %vm2096_vm1, %v2095_v0 }
 0x310   :  { %v412_v21 = vmul.f32 %v2019_v20, %v2015_v11  ;;  %1837 = vmatprep.subr.mxu1 %v2095_v0 }
 0x312   :  { %1825 = vmatmul.mubr.msk.f32.vlgmr.msra.gmra.mrb[8].mxu0 %vm390_vm3, %v412_v21  ;;  %1830 = vmatmul.mubr.msk.f32.vlgmr.msra.gmra.mrb[4].mxu1 %vm237_vm2, %v560_v14 }
 0x313   :  { %1833 = vmatpush3.xpose.msk.msra.mxu0 %vm237_vm2, %v640_v13  ;;  %1834 = vmatprep.mubr.msk.f32.mxu0 %vm2096_vm1, %v2095_v0 }
 0x314   :  { %1842 = vmatprep.subr.mxu0 %v2095_v0  ;;  %1839 = vmatprep.mubr.msk.f32.mxu1 %vm2096_vm1, %v2095_v0 }
 0x316   :  { %1835 = vmatmul.mubr.msk.f32.vlgmr.msra.gmra.mrb[10].mxu0 %vm237_vm2, %v638_v22 }
 0x317   :  { %1844 = vmatprep.mubr.msk.f32.mxu0 %vm2096_vm1, %v2095_v0 }
 0x3e1   :  { %v2224_v23 = vpop.f32.mrb[2].mxu1 }
 0x3e2   :  { %v1821_v24 = vpop.f32.mrb[3].mxu1 }
 0x3e5   :  { %v2226_v25 = vpop.f32.mrb[8].mxu0  ;;  %v633_v26 = vpop.f32.mrb[4].mxu1 }
 0x3e6   :  { %v1826_v27 = vpop.f32.mrb[9].mxu0  ;;  %v1831_v28 = vpop.f32.mrb[5].mxu1  ;;  %v715_v29 = vsel %vm390_vm3, %v633_v26, -inf }
 0x3e7   :  { %716 = vmax.xlane.f32.xlu0 %v715_v29 }
 0x3e9   :  { %v711_v30 = vpop.f32.mrb[10].mxu0 }
 0x3ea   :  { %v1836_v31 = vpop.f32.mrb[11].mxu0  ;;  %v718_v32 = vsel %vm390_vm3, %v711_v30, -inf }
 0x3eb   :  { %719 = vmax.xlane.f32.xlu1 %v718_v32 }
 0x3fc   :  { %815 = vrot.lane.b32.xlu1 %v2192_v57, %s2097_s2 }
 0x3fd   :  { %738 = vrot.lane.b32.xlu0 %v2196_v59, %s2097_s2 }
 0x400   :  { %893 = vrot.lane.b32.xlu1 %v2166_v48, %s2098_s11 }
 0x404   :  { %971 = vrot.lane.b32.xlu1 %v2173_v52, %s2098_s11 }
 0x408   :  { %969 = vrot.lane.b32.xlu1 %v2181_v53, %s2098_s11 }
 0x474   :  { %v717_v33 = vpop.xlane.xlu0 %716 }
 0x475   :  { %v721_v34 = vsub.f32 %v633_v26, %v717_v33 }
 0x477   :  { %v723_v35 = vmul.f32 1.442695, %v721_v34 }
 0x478   :  { %v720_v36 = vpop.xlane.xlu1 %719  ;;  %v739_v37 = vpop.permute.xlu0 %738 }
 0x479   :  { %2020 = vpow2.f32 %v723_v35  ;;  %v722_v38 = vsub.f32 %v711_v30, %v720_v36  ;;  %1838 = vmatpush3.msra.mxu1 %v739_v37 }
 0x47a   :  { %1847 = vmatprep.subr.mxu1 %v2095_v0 }
 0x47b   :  { %v725_v39 = vmul.f32 1.442695, %v722_v38 }
 0x47c   :  { %v816_v40 = vpop.permute.xlu1 %815 }
 0x47d   :  { %2022 = vpow2.f32 %v725_v39  ;;  %1843 = vmatpush3.msra.mxu0 %v816_v40 }
 0x47e   :  { %1852 = vmatprep.subr.mxu0 %v2095_v0 }
 0x480   :  { %v894_v47 = vpop.permute.xlu1 %893 }
 0x483   :  { %v2021_v41 = vpop.eup %2020 }
 0x484   :  { %v727_v42 = vsel %vm390_vm3, %v2021_v41, 0.0  ;;  %v972_v55 = vpop.permute.xlu1 %971 }
 0x485   :  { %728 = vadd.xlane.f32.xlu0 %v727_v42 }
 0x487   :  { %v2023_v43 = vpop.eup %2022 }
 0x488   :  { %v730_v44 = vsel %vm390_vm3, %v2023_v43, 0.0  ;;  %v970_v60 = vpop.permute.xlu1 %969 }
 0x489   :  { %731 = vadd.xlane.f32.xlu0 %v730_v44 }
 0x49f   :  { %891 = vrot.lane.b32.xlu0 %v2170_v50, %s2098_s11 }
 0x512   :  { %v729_v45 = vpop.xlane.xlu0 %728 }
 0x513   :  { %2024 = vrcp.f32 %v729_v45 }
 0x516   :  { %v732_v46 = vpop.xlane.xlu0 %731 }
 0x517   :  { %2026 = vrcp.f32 %v732_v46 }
 0x51a   :  { %v892_v58 = vpop.permute.xlu0 %891 }
 0x51d   :  { %v2025_v49 = vpop.eup %2024 }
 0x51e   :  { %v735_v51 = vmul.f32 %v2025_v49, %v2021_v41 }
 0x520   :  { %1840 = vmatmul.mubr.msk.f32.vlgmr.msra.gmra.mrb[6].mxu1 %vm390_vm3, %v735_v51 }
 0x521   :  { %v2027_v54 = vpop.eup %2026  ;;  %1848 = vmatpush3.xpose.msk.msra.mxu1 %vm237_vm2, %v894_v47  ;;  %1849 = vmatprep.mubr.msk.f32.mxu1 %vm2096_vm1, %v2095_v0 }
 0x522   :  { %v736_v56 = vmul.f32 %v2027_v54, %v2023_v43  ;;  %1857 = vmatprep.subr.mxu1 %v2095_v0 }
 0x524   :  { %1845 = vmatmul.mubr.msk.f32.vlgmr.msra.gmra.mrb[12].mxu0 %vm390_vm3, %v736_v56  ;;  %1850 = vmatmul.mubr.msk.f32.vlgmr.msra.gmra.mrb[8].mxu1 %vm237_vm2, %v892_v58 }
 0x525   :  { %1853 = vmatpush3.xpose.msk.msra.mxu0 %vm237_vm2, %v972_v55  ;;  %1854 = vmatprep.mubr.msk.f32.mxu0 %vm2096_vm1, %v2095_v0 }
 0x526   :  { %1862 = vmatprep.subr.mxu0 %v2095_v0  ;;  %1859 = vmatprep.mubr.msk.f32.mxu1 %vm2096_vm1, %v2095_v0 }
 0x528   :  { %1855 = vmatmul.mubr.msk.f32.vlgmr.msra.gmra.mrb[14].mxu0 %vm237_vm2, %v970_v60 }
 0x529   :  { %1864 = vmatprep.mubr.msk.f32.mxu0 %vm2096_vm1, %v2095_v0 }
 0x5f3   :  { %v2262_v61 = vpop.f32.mrb[6].mxu1 }
 0x5f4   :  { %v1841_v62 = vpop.f32.mrb[7].mxu1 }
 0x5f5   :  { %v1582_v62 = vld [vmem:[%s2392_s3] sm:$0xff] }
 0x5f7   :  { %v2264_v63 = vpop.f32.mrb[12].mxu0  ;;  %v965_v1 = vpop.f32.mrb[8].mxu1 }
 0x5f8   :  { %v1997_v2 = vpack.i.bf16 %v2264_v63, %v2262_v61  ;;  %v1846_v3 = vpop.f32.mrb[13].mxu0  ;;  %v1851_v4 = vpop.f32.mrb[9].mxu1  ;;  %v1047_v5 = vsel %vm390_vm3, %v965_v1, -inf  ;;  %v1584_v63 = vld [vmem:[%s2392_s3 + $0x10] sm:$0xff] }
 0x5f9   :  { %1048 = vmax.xlane.f32.xlu0 %v1047_v5  ;;  %v1586_v4 = vld [vmem:[%s2392_s3 + $0x20] sm:$0xff]  ;;  %v1587_v5 = vld [vmem:[%s2392_s3 + $0x28] sm:$0xff] }
 0x5fb   :  { %v1043_v6 = vpop.f32.mrb[14].mxu0 }
 0x5fc   :  { %v1856_v7 = vpop.f32.mrb[15].mxu0  ;;  %v1050_v8 = vsel %vm390_vm3, %v1043_v6, -inf }
 0x5fd   :  { %1051 = vmax.xlane.f32.xlu1 %v1050_v8  ;;  %v1588_v7 = vld [vmem:[%s2392_s3 + $0x30] sm:$0xff]  ;;  %v1589_v8 = vld [vmem:[%s2392_s3 + $0x38] sm:$0xff] }
 0x60e   :  { %1145 = vrot.lane.b32.xlu1 %v2192_v57, %s2098_s11 }
 0x60f   :  { %1069 = vrot.lane.b32.xlu0 %v2196_v59, %s2098_s11 }
 0x612   :  { %1223 = vrot.lane.b32.xlu1 %v2166_v48, %s2099_s12 }
 0x616   :  { %1301 = vrot.lane.b32.xlu1 %v2173_v52, %s2099_s12 }
 0x61a   :  { %1299 = vrot.lane.b32.xlu1 %v2181_v53, %s2099_s12 }
 0x686   :  { %v1049_v9 = vpop.xlane.xlu0 %1048 }
 0x687   :  { %v1053_v10 = vsub.f32 %v965_v1, %v1049_v9  ;;  %v1966_v9 = vpack.c.bf16 %v1589_v8, %v1588_v7 }
 0x689   :  { %v1055_v11 = vmul.f32 1.442695, %v1053_v10  ;;  %v1590_v10 = vld [vmem:[%s2392_s3 + $0x40] sm:$0xff] }
 0x68a   :  { %v1052_v12 = vpop.xlane.xlu1 %1051  ;;  %v1070_v13 = vpop.permute.xlu0 %1069 }
 0x68b   :  { %2028 = vpow2.f32 %v1055_v11  ;;  %v1054_v14 = vsub.f32 %v1043_v6, %v1052_v12  ;;  %1858 = vmatpush3.msra.mxu1 %v1070_v13  ;;  %v1962_v6 = vpack.c.bf16 %v1587_v5, %v1586_v4  ;;  %v1591_v11 = vld [vmem:[%s2392_s3 + $0x48] sm:$0xff]  ;;  %v1592_v13 = vld [vmem:[%s2392_s3 + $0x50] sm:$0xff] }
 0x68c   :  { %1867 = vmatprep.subr.mxu1 %v2095_v0  ;;  %v1970_v12 = vpack.c.bf16 %v1591_v11, %v1590_v10 }
 0x68d   :  { %v1057_v15 = vmul.f32 1.442695, %v1054_v14  ;;  %v1593_v14 = vld [vmem:[%s2392_s3 + $0x58] sm:$0xff] }
 0x68e   :  { %v1146_v16 = vpop.permute.xlu1 %1145 }
 0x68f   :  { %2030 = vpow2.f32 %v1057_v15  ;;  %1863 = vmatpush3.msra.mxu0 %v1146_v16  ;;  %v1974_v15 = vpack.c.bf16 %v1593_v14, %v1592_v13  ;;  %v1594_v16 = vld [vmem:[%s2392_s3 + $0x60] sm:$0xff] }
 0x690   :  { %1872 = vmatprep.subr.mxu0 %v2095_v0 }
 0x692   :  { %v1224_v20 = vpop.permute.xlu1 %1223 }
 0x695   :  { %v2029_v48 = vpop.eup %2028 }
 0x696   :  { %v1059_v52 = vsel %vm390_vm3, %v2029_v48, 0.0  ;;  %v1302_v26 = vpop.permute.xlu1 %1301 }
 0x697   :  { %1060 = vadd.xlane.f32.xlu0 %v1059_v52 }
 0x699   :  { %v2031_v53 = vpop.eup %2030 }
 0x69a   :  { %v1062_v17 = vsel %vm390_vm3, %v2031_v53, 0.0  ;;  %v1300_v28 = vpop.permute.xlu1 %1299 }
 0x69b   :  { %1063 = vadd.xlane.f32.xlu0 %v1062_v17  ;;  %v1597_v17 = vld [vmem:[%s2392_s3 + $0x78] sm:$0xff] }
 0x6b1   :  { %1221 = vrot.lane.b32.xlu0 %v2170_v50, %s2099_s12 }
 0x724   :  { %v1061_v18 = vpop.xlane.xlu0 %1060 }
 0x725   :  { %2032 = vrcp.f32 %v1061_v18 }
 0x728   :  { %v1064_v19 = vpop.xlane.xlu0 %1063 }
 0x729   :  { %2034 = vrcp.f32 %v1064_v19 }
 0x72c   :  { %v1222_v50 = vpop.permute.xlu0 %1221 }
 0x72f   :  { %v2033_v21 = vpop.eup %2032 }
 0x730   :  { %v1067_v22 = vmul.f32 %v2033_v21, %v2029_v48  ;;  %v1595_v48 = vld [vmem:[%s2392_s3 + $0x68] sm:$0xff] }
 0x731   :  { %v1978_v52 = vpack.c.bf16 %v1595_v48, %v1594_v16 }
 0x732   :  { %1860 = vmatmul.mubr.msk.f32.vlgmr.msra.gmra.mrb[10].mxu1 %vm390_vm3, %v1067_v22 }
 0x733   :  { %v2035_v24 = vpop.eup %2034  ;;  %1868 = vmatpush3.xpose.msk.msra.mxu1 %vm237_vm2, %v1224_v20  ;;  %1869 = vmatprep.mubr.msk.f32.mxu1 %vm2096_vm1, %v2095_v0 }
 0x734   :  { %v1068_v27 = vmul.f32 %v2035_v24, %v2031_v53  ;;  %1877 = vmatprep.subr.mxu1 %v2095_v0  ;;  %v1596_v53 = vld [vmem:[%s2392_s3 + $0x70] sm:$0xff] }
 0x735   :  { %v1982_v18 = vpack.c.bf16 %v1597_v17, %v1596_v53 }
 0x736   :  { %1865 = vmatmul.mubr.msk.f32.vlgmr.msra.gmra.mrb[16].mxu0 %vm390_vm3, %v1068_v27  ;;  %1870 = vmatmul.mubr.msk.f32.vlgmr.msra.gmra.mrb[12].mxu1 %vm237_vm2, %v1222_v50 }
 0x737   :  { %1873 = vmatpush3.xpose.msk.msra.mxu0 %vm237_vm2, %v1302_v26  ;;  %1874 = vmatprep.mubr.msk.f32.mxu0 %vm2096_vm1, %v2095_v0 }
 0x738   :  { %1882 = vmatprep.subr.mxu0 %v2095_v0  ;;  %1879 = vmatprep.mubr.msk.f32.mxu1 %vm2096_vm1, %v2095_v0 }
 0x73a   :  { %1875 = vmatmul.mubr.msk.f32.vlgmr.msra.gmra.mrb[18].mxu0 %vm237_vm2, %v1300_v28 }
 0x73b   :  { %1884 = vmatprep.mubr.msk.f32.mxu0 %vm2096_vm1, %v2095_v0 }
 0x805   :  { %v1141_v29 = vpop.f32.mrb[10].mxu1 }
 0x806   :  { %v1861_v30 = vpop.f32.mrb[11].mxu1 }
 0x809   :  { %v1217_v31 = vpop.f32.mrb[16].mxu0  ;;  %v1295_v32 = vpop.f32.mrb[12].mxu1 }
 0x80a   :  { %v2002_v33 = vpack.i.bf16 %v1217_v31, %v1141_v29  ;;  %v1866_v34 = vpop.f32.mrb[17].mxu0  ;;  %v1871_v35 = vpop.f32.mrb[13].mxu1  ;;  %v1377_v36 = vsel %vm390_vm3, %v1295_v32, -inf }
 0x80b   :  { %1378 = vmax.xlane.f32.xlu0 %v1377_v36 }
 0x80d   :  { %v1373_v37 = vpop.f32.mrb[18].mxu0 }
 0x80e   :  { %v1876_v38 = vpop.f32.mrb[19].mxu0  ;;  %v1380_v39 = vsel %vm390_vm3, %v1373_v37, -inf }
 0x80f   :  { %1381 = vmax.xlane.f32.xlu1 %v1380_v39 }
 0x820   :  { %1475 = vrot.lane.b32.xlu1 %v2192_v57, %s2099_s12 }
 0x824   :  { %1998 = vrot.lane.b32.xlu1 %v1997_v2, %s2099_s12  ;;  %v1585_v2 = vld [vmem:[%s2392_s3 + $0x18] sm:$0xff] }
 0x825   :  { %v1958_v3 = vpack.c.bf16 %v1585_v2, %v1584_v63 }
 0x828   :  { %2003 = vrot.lane.b32.xlu1 %v2002_v33, %s2098_s11 }
 0x898   :  { %v1379_v0 = vpop.xlane.xlu0 %1378 }
 0x899   :  { %v1383_v40 = vsub.f32 %v1295_v32, %v1379_v0  ;;  %v1727_v0 = vld [vmem:[%s2393_s4] ss:$0 sm:$0xff] }
 0x89b   :  { %v1385_v41 = vmul.f32 1.442695, %v1383_v40 }
 0x89c   :  { %v1382_v42 = vpop.xlane.xlu1 %1381 }
 0x89d   :  { %2036 = vpow2.f32 %v1385_v41  ;;  %v1384_v43 = vsub.f32 %v1373_v37, %v1382_v42 }
 0x89f   :  { %v1387_v44 = vmul.f32 1.442695, %v1384_v43 }
 0x8a0   :  { %v1476_v45 = vpop.permute.xlu1 %1475 }
 0x8a1   :  { %2038 = vpow2.f32 %v1387_v44  ;;  %1883 = vmatpush3.msra.mxu0 %v1476_v45 }
 0x8a4   :  { %v1999_v26 = vpop.permute.xlu1 %1998 }
 0x8a5   :  { %v2001_v50 = vunpack.i.h.bf16 %v1999_v26  ;;  %v2000_v28 = vunpack.i.l.bf16 %v1999_v26 }
 0x8a7   :  { %v2037_v46 = vpop.eup %2036  ;;  %v1576_v32 = vsel %vm237_vm2, %v2226_v25, %v2001_v50  ;;  %v1575_v35 = vsel %vm237_vm2, %v2224_v23, %v2000_v28 }
 0x8a8   :  { %v1389_v57 = vsel %vm390_vm3, %v2037_v46, 0.0  ;;  %v2004_v27 = vpop.permute.xlu1 %2003 }
 0x8a9   :  { %1390 = vadd.xlane.f32.xlu0 %v1389_v57  ;;  %v2006_v29 = vunpack.i.h.bf16 %v2004_v27  ;;  %v2005_v30 = vunpack.i.l.bf16 %v2004_v27 }
 0x8ab   :  { %v2039_v47 = vpop.eup %2038  ;;  %v1578_v36 = vsel %vm78_vm0, %v1576_v32, %v2006_v29  ;;  %v1577_v37 = vsel %vm78_vm0, %v1575_v35, %v2005_v30 }
 0x8ac   :  { %v1392_v49 = vsel %vm390_vm3, %v2039_v47, 0.0 }
 0x8ad   :  { %1393 = vadd.xlane.f32.xlu0 %v1392_v49 }
 0x8c3   :  { %1399 = vrot.lane.b32.xlu0 %v2196_v59, %s2099_s12  ;;  %v1583_v59 = vld [vmem:[%s2392_s3 + $0x8] sm:$0xff] }
 0x8c4   :  { %v1954_v1 = vpack.c.bf16 %v1583_v59, %v1582_v62 }
 0x936   :  { %v1391_v51 = vpop.xlane.xlu0 %1390 }
 0x937   :  { %2040 = vrcp.f32 %v1391_v51 }
 0x93a   :  { %v1394_v54 = vpop.xlane.xlu0 %1393 }
 0x93b   :  { %2042 = vrcp.f32 %v1394_v54 }
 0x93e   :  { %v1400_v55 = vpop.permute.xlu0 %1399 }
 0x93f   :  { %1878 = vmatpush3.msra.mxu1 %v1400_v55 }
 0x940   :  { %1955 = vmatprep.subr.bf16.mxu1 %v1954_v1 }
 0x941   :  { %v2041_v56 = vpop.eup %2040 }
 0x942   :  { %v1397_v58 = vmul.f32 %v2041_v56, %v2037_v46 }
 0x944   :  { %1880 = vmatmul.mubr.msk.f32.vlgmr.msra.gmra.mrb[14].mxu1 %vm390_vm3, %v1397_v58 }
 0x945   :  { %v2043_v60 = vpop.eup %2042  ;;  %1957 = vmatpush3.bf16.msra.mxu1 %v1954_v1 }
 0x946   :  { %v1398_v61 = vmul.f32 %v2043_v60, %v2039_v47  ;;  %1959 = vmatprep.subr.bf16.mxu1 %v1958_v3 }
 0x948   :  { %1885 = vmatmul.mubr.msk.f32.vlgmr.msra.gmra.mrb[20].mxu0 %vm390_vm3, %v1398_v61 }
 0x949   :  { %1961 = vmatpush3.bf16.msra.mxu1 %v1958_v3 }
 0x94a   :  { %1963 = vmatprep.subr.bf16.mxu1 %v1962_v6 }
 0x94d   :  { %1965 = vmatpush3.bf16.msra.mxu1 %v1962_v6 }
 0x94e   :  { %1967 = vmatprep.subr.bf16.mxu1 %v1966_v9 }
 0x951   :  { %1969 = vmatpush3.bf16.msra.mxu1 %v1966_v9 }
 0x952   :  { %1971 = vmatprep.subr.bf16.mxu1 %v1970_v12 }
 0x955   :  { %1973 = vmatpush3.bf16.msra.mxu1 %v1970_v12 }
 0x956   :  { %1975 = vmatprep.subr.bf16.mxu1 %v1974_v15 }
 0x959   :  { %1977 = vmatpush3.bf16.msra.mxu1 %v1974_v15 }
 0x95a   :  { %1979 = vmatprep.subr.bf16.mxu1 %v1978_v52 }
 0x95d   :  { %1981 = vmatpush3.bf16.msra.mxu1 %v1978_v52 }
 0x95e   :  { %1983 = vmatprep.subr.bf16.mxu1 %v1982_v18 }
 0x961   :  { %1985 = vmatpush3.bf16.msra.mxu1 %v1982_v18 }
 0xa17   :  { %v1471_v19 = vpop.f32.mrb[14].mxu1 }
 0xa18   :  { %v1881_v20 = vpop.f32.mrb[15].mxu1 }
 0xa1b   :  { %v1547_v21 = vpop.f32.mrb[20].mxu0 }
 0xa1c   :  { %v2007_v22 = vpack.i.bf16 %v1547_v21, %v1471_v19  ;;  %v1886_v24 = vpop.f32.mrb[21].mxu0 }
 0xa1e   :  { %2008 = vrot.lane.b32.xlu0 %v2007_v22, %s2097_s2 }
 0xa90   :  { %v2009_v31 = vpop.permute.xlu0 %2008 }
 0xa91   :  { %v2011_v33 = vunpack.i.h.bf16 %v2009_v31  ;;  %v2010_v34 = vunpack.i.l.bf16 %v2009_v31 }
 0xa93   :  { %v1580_v38 = vsel %vm1579_vm4, %v1577_v37, %v2010_v34  ;;  %v1581_v39 = vsel %vm1579_vm4, %v1578_v36, %v2011_v33 }
 0xa94   :  { %1919 = vmatprep.mubr.f32.mxu1 %v1580_v38 }
 0xa95   :  { %1920 = vmatmul.mubr.f32.vlgmr.msra.gmra.mrb[16].mxu1 %v1581_v39 }
 0xb68   :  { %v1921_v25 = vpop.f32.mrb[16].mxu1 }
 0xb69   :  { %v1677_v40 = vadd.f32 %v1921_v25, %v1727_v0  ;;  %v1671_v41 = vpop.f32.mrb[17].mxu1 }
 0xb6a   :  { %v1672_v42 = vadd.f32 %v1727_v0, %v1671_v41 }
 0xb6b   :  { %1681 = vst.msk [vmem:[#allocation5 + $0x8] sm:$0xff] %vm237_vm2, %v1677_v40 }
 0xb6c   :  { %1680 = vst.msk [vmem:[#allocation5] sm:$0xff] %vm237_vm2, %v1672_v42 }
 0xb6d   :  { %2077 = shalt.err (!%p2074_p12)
}
 0xb6e   :  { %s2078_s22 = scalar_lea.hbm %s2394_s5, 256 }
 0xb6f   :  { %p2079_p13 = scmp.ne.s32.totalorder %s2394_s5, %s2078_s22  ;;  %p2082_p0 = scmp.lt.u32.totalorder %s2078_s22, %s2394_s5 }
 0xb71   :  { %p2084_p1 = pnand %p2082_p0, %p2079_p13 }
 0xb73   :  { %2087 = shalt.err (!%p2084_p1)
}
 0xb74   :  { %s2101_s27 = smov 128   ;;  %s2102_s28 = smov 8  }
 0xb75   :  { %1693 = dma.vmem_to_hbm [thread:$0]  %s1688_s19, 256, %s2394_s5, [#allocation4], %s2101_s27, %s2101_s27, %s2102_s28  }
 0xb76   :  { %2090 = dma.done.wait [#allocation4], 256  }
 0xb77   :  { %2091 = vsyncadd [#allocation4], 4294967040 }
 0xb78   :  { %1697 = vsyncpa [#allocation3], 1 }
 0xb79   :  { %1698 = vsyncpa [#allocation4], 1 }

</bundles_post_ra>
